<compile_context>
chip_gen: v5e
topology: v5e:2x2
jax: 0.10.0
libtpu: 0.0.40
codegen_flags: <defaults>
</compile_context>

<pallas_src>
import functools

import jax
import jax.numpy as jnp
from jax.experimental import pallas as pl
from jax.experimental.pallas import tpu as pltpu


_LANE = 128
_SUBLANE = 8


def _round_up(x, m):
    return (x + m - 1) // m * m


def _vmem_budget_bytes():
    """Generation-aware VMEM budget with headroom for Mosaic scratch."""
    try:
        cap = int(pltpu.get_tpu_info().vmem_capacity_bytes)
    except Exception:
        cap = 64 * 1024 * 1024          # conservative floor (v7x has 64 MiB/TC)
    return (cap * 3) // 4               # 48 MiB on v7x, 96 MiB on v5e/v6e


def _vmem_bytes_estimate(bb, d):
    """Conservative VMEM footprint for one grid step (double-buffered I/O)."""
    lane = lambda n: _round_up(n, _LANE)
    sub = lambda n: _round_up(n, _SUBLANE)
    x_tile = sub(bb) * lane(d) * 4                       # f32 x tile
    out_tile = sub(bb) * _LANE * 4                       # (bb, 1) f32, lane-padded
    inter = sub(bb) * (lane(128) * 6 + lane(64) * 4 + lane(d) * 2)   # h1/h2 + bf16 copies
    w = (sub(d) * lane(128) * 2 + sub(128) * lane(64) * 2            # w1, w2 (bf16)
         + 4 * _SUBLANE * _LANE * 4)                                 # b1, b2, w3, b3
    return 2 * (x_tile + out_tile) + inter + 2 * w


def _choose_block_batch(batch, d, requested, vmem_budget):
    # Tiny batches: one exact block (no ragged masking at all).
    if batch <= _LANE:
        return max(_SUBLANE, _round_up(batch, _SUBLANE))
    bb = max(_LANE, _round_up(min(requested, batch), _LANE))
    # Shrink until the (conservative) VMEM footprint fits the budget.
    # TODO(synk): for very large D, tile the feature axis instead (K grid axis
    # marked 'arbitrary' + f32 h1 accumulator) rather than shrinking bb.
    while bb > _LANE and _vmem_bytes_estimate(bb, d) > vmem_budget:
        bb -= _LANE
    # Keep >= 4 grid steps when batch permits (>= 2 per v7x TensorCore so the
    # next x DMA hides under the current step's matmuls; harmless on v5e/v6e).
    if batch >= 4 * _LANE:
        bb = min(bb, max(_LANE, (batch // 4) // _LANE * _LANE))
    elif batch >= 2 * _LANE:
        bb = min(bb, max(_LANE, (batch // 2) // _LANE * _LANE))
    # Re-balance: same number of steps, smallest multiple-of-128 block, so the
    # ragged last block wastes as little work as possible.
    steps = -(-batch // bb)
    bb = min(bb, _round_up(-(-batch // steps), _LANE))
    return max(bb, _SUBLANE)


def _mlp_kernel(x_ref, w1_ref, b1_ref, w2_ref, b2_ref, w3_ref, b3_ref, o_ref):
    """Fused 3-layer MLP on a (bb, D) batch tile in natural layout."""
    # In-kernel f32 -> bf16 cast: x is read from HBM once (4 B/elt), cast in VMEM.
    x = x_ref[...].astype(jnp.bfloat16)                               # (bb, D)
    # layer 1: (bb, D) @ (D, 128) -> (bb, 128), f32 accumulation on the MXU
    h1 = jnp.dot(x, w1_ref[...], preferred_element_type=jnp.float32) + b1_ref[...]
    h1 = jnp.maximum(h1, 0.0)
    # layer 2: (bb, 128) @ (128, 64) -> (bb, 64)
    h2 = jnp.dot(h1.astype(w2_ref.dtype), w2_ref[...],
                 preferred_element_type=jnp.float32) + b2_ref[...]
    h2 = jnp.maximum(h2, 0.0)
    # layer 3 (64 -> 1): VPU multiply + lane (XLU) reduction, no N=1 MXU matmul
    out = jnp.sum(h2 * w3_ref[...], axis=-1, keepdims=True) + b3_ref[...]
    o_ref[...] = out.astype(o_ref.dtype)


@functools.partial(jax.jit, static_argnames=("block_batch",))
def simple_dnn_forward(x, w1, b1, w2, b2, w3, b3, *, block_batch=4096):
    """x: [B, D] float -> [B, 1] float32.

    Kernel-layout params (see init_simple_dnn_params):
      w1: [D, 128] bf16, w2: [128, 64] bf16 (torch weights transposed once),
      w3: [1, 64] f32, b1: [1, 128], b2: [1, 64], b3: [1, 1] f32.
    """
    B, D = x.shape
    H1 = w1.shape[1]    # 128
    H2 = w2.shape[1]    # 64

    vmem_budget = _vmem_budget_bytes()
    bb = _choose_block_batch(B, D, block_batch, vmem_budget)
    steps = -(-B // bb)                 # ragged last block handled by Pallas masking
    grid = (steps,)

    flops = 2 * steps * bb * (D * H1 + H1 * H2 + H2)
    bytes_accessed = (B * D * x.dtype.itemsize + B * 4
                      + (D * H1 + H1 * H2) * 2 + (H1 + H2 + H2 + 1) * 4)
    vmem_limit = int(min(vmem_budget,
                         max(32 * 1024 * 1024, 2 * _vmem_bytes_estimate(bb, D))))

    # Constant index_maps on weights/biases -> blocks stay VMEM-resident across
    # grid steps (no per-step re-DMA).
    in_specs = [
        pl.BlockSpec((bb, D), lambda i: (i, 0)),      # x, batch tiled on sublanes
        pl.BlockSpec((D, H1), lambda i: (0, 0)),      # w1
        pl.BlockSpec((1, H1), lambda i: (0, 0)),      # b1
        pl.BlockSpec((H1, H2), lambda i: (0, 0)),     # w2
        pl.BlockSpec((1, H2), lambda i: (0, 0)),      # b2
        pl.BlockSpec((1, H2), lambda i: (0, 0)),      # w3 (row vector)
        pl.BlockSpec((1, 1), lambda i: (0, 0)),       # b3
    ]
    out_specs = pl.BlockSpec((bb, 1), lambda i: (i, 0))

    return pl.pallas_call(
        _mlp_kernel,
        out_shape=jax.ShapeDtypeStruct((B, 1), jnp.float32),
        grid=grid,
        in_specs=in_specs,
        out_specs=out_specs,
        compiler_params=pltpu.CompilerParams(
            dimension_semantics=("parallel",),
            vmem_limit_bytes=vmem_limit),
        cost_estimate=pl.CostEstimate(
            flops=flops, transcendentals=0, bytes_accessed=bytes_accessed),
    )(x, w1, b1, w2, b2, w3, b3)


def init_simple_dnn_params(key, input_size):
    """Torch-default-like init (U[-1/sqrt(fan_in), +1/sqrt(fan_in)]).

    Returns kernel-layout params (torch [out, in] weights transposed once):
      w1: [D, 128] bf16, w2: [128, 64] bf16, w3: [1, 64] f32,
      b1: [1, 128], b2: [1, 64], b3: [1, 1] f32.
    """
    dims = [(input_size, 128), (128, 64), (64, 1)]
    raw = []
    for fan_in, fan_out in dims:
        key, kw, kb = jax.random.split(key, 3)
        bound = 1.0 / (fan_in ** 0.5)
        w = jax.random.uniform(kw, (fan_out, fan_in), jnp.float32, -bound, bound)
        b = jax.random.uniform(kb, (1, fan_out), jnp.float32, -bound, bound)
        raw.append((w, b))
    (w1, b1), (w2, b2), (w3, b3) = raw
    return (w1.T.astype(jnp.bfloat16), b1,
            w2.T.astype(jnp.bfloat16), b2,
            w3, b3)     # w3 kept as torch [1, 64] row, f32


def _reference_forward(x, w1, b1, w2, b2, w3, b3):
    """Mirrors the kernel math (bf16 matmul operands, f32 accumulation)."""
    h1 = jnp.maximum(
        jnp.dot(x.astype(jnp.bfloat16), w1, preferred_element_type=jnp.float32)
        + b1, 0.0)
    h2 = jnp.maximum(
        jnp.dot(h1.astype(jnp.bfloat16), w2, preferred_element_type=jnp.float32)
        + b2, 0.0)
    return jnp.sum(h2 * w3, axis=-1, keepdims=True) + b3


if __name__ == "__main__":
    key = jax.random.PRNGKey(0)
    key, kx = jax.random.split(key)

    input_size = 32
    params = init_simple_dnn_params(key, input_size)

    # Small batch: single exact block, no ragged edge.
    x_small = jax.random.normal(kx, (8, input_size), jnp.float32)
    out_small = jax.block_until_ready(simple_dnn_forward(x_small, *params))
    ref_small = _reference_forward(x_small, *params)
    assert out_small.shape == (8, 1), out_small.shape
    assert jnp.allclose(out_small, ref_small, atol=2e-3, rtol=2e-3), "small-batch mismatch"

    # Ragged multi-step batch: 3 grid steps of 128 rows, last block only 4 valid
    # rows (exercises Pallas boundary masking — no wrapper pad).
    key, kx2 = jax.random.split(key)
    x_ragged = jax.random.normal(kx2, (260, input_size), jnp.float32)
    out_ragged = jax.block_until_ready(simple_dnn_forward(x_ragged, *params))
    ref_ragged = _reference_forward(x_ragged, *params)
    assert out_ragged.shape == (260, 1), out_ragged.shape
    assert jnp.allclose(out_ragged, ref_ragged, atol=2e-3, rtol=2e-3), "ragged-batch mismatch"

    print("KERNEL_OK")
</pallas_src>

<mosaic_0001>
module attributes {stable_mosaic.version = 11 : i64} {
  func.func @_mlp_kernel(%arg0: i32, %arg1: memref<8x32xf32, #tpu.memory_space<vmem>>, %arg2: memref<32x128xbf16, #tpu.memory_space<vmem>>, %arg3: memref<1x128xf32, #tpu.memory_space<vmem>>, %arg4: memref<128x64xbf16, #tpu.memory_space<vmem>>, %arg5: memref<1x64xf32, #tpu.memory_space<vmem>>, %arg6: memref<1x64xf32, #tpu.memory_space<vmem>>, %arg7: memref<1x1xf32, #tpu.memory_space<vmem>>, %arg8: memref<8x1xf32, #tpu.memory_space<vmem>>) attributes {dimension_semantics = [#tpu.dimension_semantics<parallel>], iteration_bounds = array<i64: 1>, scalar_prefetch = 0 : i64, scratch_operands = 0 : i64, tpu.core_type = #tpu.core_type<tc>, window_params = [{transform_indices = @transform_0, window_bounds = array<i64: 8, 32>}, {pipeline_mode = #tpu.pipeline_mode<synchronous>, transform_indices = @transform_1, window_bounds = array<i64: 32, 128>}, {pipeline_mode = #tpu.pipeline_mode<synchronous>, transform_indices = @transform_2, window_bounds = array<i64: 1, 128>}, {pipeline_mode = #tpu.pipeline_mode<synchronous>, transform_indices = @transform_3, window_bounds = array<i64: 128, 64>}, {pipeline_mode = #tpu.pipeline_mode<synchronous>, transform_indices = @transform_4, window_bounds = array<i64: 1, 64>}, {pipeline_mode = #tpu.pipeline_mode<synchronous>, transform_indices = @transform_5, window_bounds = array<i64: 1, 64>}, {pipeline_mode = #tpu.pipeline_mode<synchronous>, transform_indices = @transform_6, window_bounds = array<i64: 1, 1>}, {transform_indices = @transform_7, window_bounds = array<i64: 8, 1>}]} {
    %c0 = arith.constant 0 : index
    %c0_0 = arith.constant 0 : index
    %0 = vector.load %arg1[%c0, %c0_0] : memref<8x32xf32, #tpu.memory_space<vmem>>, vector<8x32xf32>
    %1 = arith.truncf %0 : vector<8x32xf32> to vector<8x32xbf16>
    %c0_1 = arith.constant 0 : index
    %c0_2 = arith.constant 0 : index
    %2 = vector.load %arg2[%c0_1, %c0_2] : memref<32x128xbf16, #tpu.memory_space<vmem>>, vector<32x128xbf16>
    %cst = arith.constant dense<0.000000e+00> : vector<8x128xf32>
    %3 = tpu.matmul %1, %2, %cst {dimension_numbers = #tpu.dot_dimension_numbers<[1], [0], [0], [1], [0, 0, 1, 1], [], []>} : vector<8x32xbf16>, vector<32x128xbf16>, vector<8x128xf32> -> vector<8x128xf32>
    %c0_3 = arith.constant 0 : index
    %c0_4 = arith.constant 0 : index
    %4 = vector.load %arg3[%c0_3, %c0_4] : memref<1x128xf32, #tpu.memory_space<vmem>>, vector<1x128xf32>
    %5 = vector.broadcast %4 : vector<1x128xf32> to vector<8x128xf32>
    %6 = arith.addf %3, %5 : vector<8x128xf32>
    %cst_5 = arith.constant 0.000000e+00 : f32
    %7 = vector.broadcast %cst_5 : f32 to vector<8x128xf32>
    %8 = arith.maximumf %6, %7 : vector<8x128xf32>
    %9 = arith.truncf %8 : vector<8x128xf32> to vector<8x128xbf16>
    %c0_6 = arith.constant 0 : index
    %c0_7 = arith.constant 0 : index
    %10 = vector.load %arg4[%c0_6, %c0_7] : memref<128x64xbf16, #tpu.memory_space<vmem>>, vector<128x64xbf16>
    %cst_8 = arith.constant dense<0.000000e+00> : vector<8x64xf32>
    %11 = tpu.matmul %9, %10, %cst_8 {dimension_numbers = #tpu.dot_dimension_numbers<[1], [0], [0], [1], [0, 0, 1, 1], [], []>} : vector<8x128xbf16>, vector<128x64xbf16>, vector<8x64xf32> -> vector<8x64xf32>
    %c0_9 = arith.constant 0 : index
    %c0_10 = arith.constant 0 : index
    %12 = vector.load %arg5[%c0_9, %c0_10] : memref<1x64xf32, #tpu.memory_space<vmem>>, vector<1x64xf32>
    %13 = vector.broadcast %12 : vector<1x64xf32> to vector<8x64xf32>
    %14 = arith.addf %11, %13 : vector<8x64xf32>
    %cst_11 = arith.constant 0.000000e+00 : f32
    %15 = vector.broadcast %cst_11 : f32 to vector<8x64xf32>
    %16 = arith.maximumf %14, %15 : vector<8x64xf32>
    %c0_12 = arith.constant 0 : index
    %c0_13 = arith.constant 0 : index
    %17 = vector.load %arg6[%c0_12, %c0_13] : memref<1x64xf32, #tpu.memory_space<vmem>>, vector<1x64xf32>
    %18 = vector.broadcast %17 : vector<1x64xf32> to vector<8x64xf32>
    %19 = arith.mulf %16, %18 : vector<8x64xf32>
    %cst_14 = arith.constant dense<0.000000e+00> : vector<8xf32>
    %20 = vector.multi_reduction <add>, %19, %cst_14 [1] : vector<8x64xf32> to vector<8xf32>
    %21 = vector.shape_cast %20 : vector<8xf32> to vector<8x1xf32>
    %c0_15 = arith.constant 0 : index
    %c0_16 = arith.constant 0 : index
    %22 = vector.load %arg7[%c0_15, %c0_16] : memref<1x1xf32, #tpu.memory_space<vmem>>, vector<1x1xf32>
    %23 = vector.broadcast %22 : vector<1x1xf32> to vector<8x1xf32>
    %24 = arith.addf %21, %23 : vector<8x1xf32>
    %c0_17 = arith.constant 0 : index
    %c0_18 = arith.constant 0 : index
    %25 = vector.load %arg8[%c0_17, %c0_18] : memref<8x1xf32, #tpu.memory_space<vmem>>, vector<8x1xf32>
    tpu.vector_store %arg8[%c0_17, %c0_18], %24 {strides = array<i32>} : memref<8x1xf32, #tpu.memory_space<vmem>>, vector<8x1xf32>,
    return
  }
  func.func @transform_0(%arg0: i32) -> (i32, i32) {
    %c0_i32 = arith.constant 0 : i32
    %c0_i32_0 = arith.constant 0 : i32
    return %arg0, %c0_i32 : i32, i32
  }
  func.func @transform_1(%arg0: i32) -> (i32, i32) {
    %c0_i32 = arith.constant 0 : i32
    %c0_i32_0 = arith.constant 0 : i32
    %c0_i32_1 = arith.constant 0 : i32
    return %c0_i32, %c0_i32_0 : i32, i32
  }
  func.func @transform_2(%arg0: i32) -> (i32, i32) {
    %c0_i32 = arith.constant 0 : i32
    %c0_i32_0 = arith.constant 0 : i32
    %c0_i32_1 = arith.constant 0 : i32
    return %c0_i32, %c0_i32_0 : i32, i32
  }
  func.func @transform_3(%arg0: i32) -> (i32, i32) {
    %c0_i32 = arith.constant 0 : i32
    %c0_i32_0 = arith.constant 0 : i32
    %c0_i32_1 = arith.constant 0 : i32
    return %c0_i32, %c0_i32_0 : i32, i32
  }
  func.func @transform_4(%arg0: i32) -> (i32, i32) {
    %c0_i32 = arith.constant 0 : i32
    %c0_i32_0 = arith.constant 0 : i32
    %c0_i32_1 = arith.constant 0 : i32
    return %c0_i32, %c0_i32_0 : i32, i32
  }
  func.func @transform_5(%arg0: i32) -> (i32, i32) {
    %c0_i32 = arith.constant 0 : i32
    %c0_i32_0 = arith.constant 0 : i32
    %c0_i32_1 = arith.constant 0 : i32
    return %c0_i32, %c0_i32_0 : i32, i32
  }
  func.func @transform_6(%arg0: i32) -> (i32, i32) {
    %c0_i32 = arith.constant 0 : i32
    %c0_i32_0 = arith.constant 0 : i32
    %c0_i32_1 = arith.constant 0 : i32
    return %c0_i32, %c0_i32_0 : i32, i32
  }
  func.func @transform_7(%arg0: i32) -> (i32, i32) {
    %c0_i32 = arith.constant 0 : i32
    %c0_i32_0 = arith.constant 0 : i32
    return %arg0, %c0_i32 : i32, i32
  }
}

</mosaic_0001>

<bundles_post_ra>
// kernel: simple_dnn_forward.1
= control target key start
LH: loop header
LB: loop body
LE: loop exit
PB: predicated region body
PF: predicated region fallthrough
CT: control target
= control target key end

     0   :  { %vm51_vm0 = vcmask 261120   ;;  %vm157_vm1 = vcmask 523264   ;;  %vm166_vm2 = vcmask 7168   ;;  %s315_s1 = inlined_call_operand.vmem [shape: bf16[32,128], index: 1, kind: input, shape index: {}]   ;;  %s316_s0 = inlined_call_operand.vmem [shape: f32[8,32], index: 0, kind: input, shape index: {}]   ;;  %s317_s3 = inlined_call_operand.vmem [shape: bf16[128,64], index: 3, kind: input, shape index: {}]   ;;  %s318_s2 = inlined_call_operand.vmem [shape: f32[1,128], index: 2, kind: input, shape index: {}]   ;;  %s319_s4 = inlined_call_operand.vmem [shape: f32[1,64], index: 4, kind: input, shape index: {}]   ;;  %s320_s5 = inlined_call_operand.vmem [shape: f32[1,64], index: 5, kind: input, shape index: {}]   ;;  %s321_s6 = inlined_call_operand.<no memory space> [shape: f32[1,1], index: 6, kind: input, shape index: {}]   ;;  %s322_s7 = inlined_call_operand.vmem [shape: f32[8,1], index: 7, kind: output, shape index: {}]  }
   0x1   :  { %v214_v0 = vld [vmem:[%s315_s1 + $0x8] sm:$0xff]  ;;  %v222_v1 = vld [vmem:[%s317_s3 + $0x38] sm:$0xff]  ;;  %v213_v2 = vld [vmem:[%s315_s1] sm:$0xff]  ;;  %v12_v18 = vstv %s321_s6 }
   0x2   :  { %61 = vmatpush.bf16.msra.mxu0 %v214_v0  ;;  %v29_v3 = vld [vmem:[%s316_s0] sm:$0xff]  ;;  %138 = vmatpush.bf16.msra.mxu1 %v222_v1  ;;  %v221_v4 = vld [vmem:[%s317_s3 + $0x30] sm:$0xff]  ;;  %v220_v6 = vld [vmem:[%s317_s3 + $0x28] sm:$0xff]  ;;  %13 = vst [vmem:[#allocation2] sm:$0x1] %v12_v18 }
   0x3   :  { %v30_v5 = vpack.c.bf16 %v29_v3, %v29_v3  ;;  %v219_v7 = vld [vmem:[%s317_s3 + $0x20] sm:$0xff]  ;;  %v218_v8 = vld [vmem:[%s317_s3 + $0x18] sm:$0xff]  ;;  %v217_v9 = vld [vmem:[%s317_s3 + $0x10] sm:$0xff] }
   0x4   :  { %v216_v10 = vld [vmem:[%s317_s3 + $0x8] sm:$0xff]  ;;  %v215_v11 = vld [vmem:[%s317_s3] sm:$0xff] }
   0x5   :  { %v223_v12 = vld [vmem:[%s318_s2] ss:$0 sm:$0xff] }
   0x6   :  { %62 = vmatpush.bf16.msra.mxu0 %v213_v2  ;;  %139 = vmatpush.bf16.msra.mxu1 %v221_v4  ;;  %v224_v19 = vld [vmem:[%s319_s4] ss:$0 sm:$0xff] }
   0x7   :  { %v225_v22 = vld [vmem:[%s320_s5] ss:$0 sm:$0xff] }
   0x9   :  { %180 = vmatmul.msk.bf16.vlgmr.msra.gmra.mxu0 %vm51_vm0, %v30_v5  ;;  %v226_v27 = vld [vmem:[#allocation2] ss:$0 sm:$0xff] }
   0xa   :  { %140 = vmatpush.bf16.msra.mxu1 %v220_v6 }
   0xe   :  { %141 = vmatpush.bf16.msra.mxu1 %v219_v7 }
  0x12   :  { %142 = vmatpush.bf16.msra.mxu1 %v218_v8 }
  0x16   :  { %143 = vmatpush.bf16.msra.mxu1 %v217_v9 }
  0x1a   :  { %144 = vmatpush.bf16.msra.mxu1 %v216_v10 }
  0x1e   :  { %145 = vmatpush.bf16.msra.mxu1 %v215_v11 }
  0x86   :  { %v64_v13 = vpop.f32.mrf.mxu0 }
  0x87   :  { %v65_v14 = vadd.f32 %v223_v12, %v64_v13 }
  0x89   :  { %v68_v15 = vmax.f32 %v65_v14, 0.0 }
  0x8b   :  { %v69_v16 = vpack.c.bf16 %v68_v15, %v68_v15 }
  0x8d   :  { %146 = vmatmul.bf16.vlgmr.msra.gmra.mxu1 %v69_v16 }
  0x8e   :  { %v66_v17 = vpop.f32.mrf.mxu0 }
 0x10a   :  { %v147_v20 = vpop.f32.mrf.mxu1 }
 0x10b   :  { %v148_v21 = vadd.f32 %v224_v19, %v147_v20 }
 0x10d   :  { %v151_v23 = vmax.f32 %v148_v21, 0.0 }
 0x10f   :  { %v156_v24 = vmul.f32 %v225_v22, %v151_v23 }
 0x111   :  { %v158_v25 = vsel %vm157_vm1, %v156_v24, 0.0 }
 0x112   :  { %v149_v26 = vpop.f32.mrf.mxu1  ;;  %159 = vadd.xlane.f32.xlu0 %v158_v25 }
 0x185   :  { %v160_v28 = vpop.xlane.xlu0 %159 }
 0x186   :  { %v165_v29 = vadd.f32 %v226_v27, %v160_v28 }
 0x188   :  { %167 = vst.msk [vmem:[%s322_s7] sm:$0xff] %vm166_vm2, %v165_v29 }

</bundles_post_ra>
